<compile_context>
chip_gen: v5e
topology: v5e:2x2
jax: 0.10.0
libtpu: 0.0.40
codegen_flags: <defaults>
</compile_context>

<pallas_src>
import functools

import jax
import jax.numpy as jnp
from jax import lax
from jax.experimental import pallas as pl
from jax.experimental.pallas import tpu as pltpu


def _make_linear_kernel(compute_dtype, precision):
    def kernel(x_ref, w_ref, b_ref, o_ref):
        # x_ref: (TM, dim_in) native dtype; w_ref: (dim_in, TN) compute_dtype;
        # b_ref: (1, TN) f32; o_ref: (TM, TN) f32.
        x = x_ref[...].astype(compute_dtype)          # .float()-style in-kernel cast
        acc = jnp.dot(                                 # native (M,K)x(K,N) MXU path
            x, w_ref[...],
            preferred_element_type=jnp.float32,
            precision=precision,
        )
        o_ref[...] = (acc + b_ref[...]).astype(o_ref.dtype)
    return kernel


def _round_up(v, m):
    return ((v + m - 1) // m) * m


def _sublane_for(dtype):
    # f32 -> 8, bf16/f16 -> 16, int8/fp8 -> 32 rows per sublane tile.
    return {4: 8, 2: 16, 1: 32}.get(jnp.dtype(dtype).itemsize, 8)


def _choose_tiles(n, dim_in, hidden, x_dtype):
    """Pick (row tile tm, hidden tile tn) from the *padded* VMEM footprint.

    Padded footprint per the (8,128)/(16,128)/(32,128) VMEM tiling:
      x tile  : tm * round_up(dim_in,128) * itemsize(x)      (double buffered)
      out tile: tm * round_up(tn,128) * 4                    (double buffered)
      weight  : round_up(dim_in,8) * round_up(tn,128) * 4    (double buffered)
    Total budget <= ~48 MiB so the kernel fits v7x's 64 MiB physical VMEM;
    v5e/v6e (128 MiB) simply have extra headroom.
    """
    VMEM_BUDGET = 48 * 1024 * 1024
    WEIGHT_BUDGET = 16 * 1024 * 1024

    x_item = jnp.dtype(x_dtype).itemsize
    sub = _sublane_for(x_dtype)
    lanes_in = _round_up(dim_in, 128)

    def w_tile_bytes(tn):
        return 2 * _round_up(dim_in, 8) * _round_up(tn, 128) * 4

    # Hidden (output-lane) tile: whole weight if it fits, else multiple of 128.
    if hidden <= 128 or w_tile_bytes(hidden) <= WEIGHT_BUDGET:
        tn = hidden
    else:
        tn = (WEIGHT_BUDGET // (2 * _round_up(dim_in, 8) * 4)) // 128 * 128
        tn = max(128, min(tn, _round_up(hidden, 128)))

    # Row tile from the remaining budget.
    fixed = w_tile_bytes(tn) + 2 * 8 * _round_up(tn, 128) * 4      # weight + bias bufs
    per_row = 2 * (lanes_in * x_item + _round_up(tn, 128) * 4)     # dbl-buffered x + out
    tm = max(sub, (VMEM_BUDGET - fixed) // max(1, per_row))
    # Keep >= ~4 row steps when N allows it (feeds both v7x TensorCores).
    tm = min(tm, max(sub, _round_up(pl.cdiv(n, 4), sub)))
    tm = max(sub, (tm // sub) * sub)
    return tm, tn


@functools.partial(jax.jit, static_argnames=("use_bf16_compute",))
def feature_encoder_forward(x, weight, bias, *, use_bf16_compute=False):
    """Pallas equivalent of nn.Linear(dim_in, hidden)(x.float()).

    x:      (N, dim_in)  any float/int dtype (cast in-kernel, like .float())
    weight: (hidden, dim_in)  PyTorch nn.Linear layout
    bias:   (hidden,)
    returns (N, hidden) float32
    """
    n, dim_in = x.shape
    hidden, dim_in_w = weight.shape
    assert dim_in_w == dim_in, "weight / x dim_in mismatch"

    compute_dtype = jnp.bfloat16 if use_bf16_compute else jnp.float32
    # HIGHEST precision => true f32 MXU matmul, matching torch's f32 Linear.
    precision = None if use_bf16_compute else lax.Precision.HIGHEST

    # One-time wrapper-side layout/cast work (tiny XLA ops, done once in HBM):
    w_t = weight.T.astype(compute_dtype)          # (dim_in, hidden)
    b2 = bias.astype(jnp.float32).reshape(1, hidden)

    tm, tn = _choose_tiles(n, dim_in, hidden, x.dtype)
    grid = (pl.cdiv(hidden, tn), pl.cdiv(n, tm))  # hidden outer -> weight DMA'd once/tile

    x_bytes = n * dim_in * jnp.dtype(x.dtype).itemsize
    w_bytes = w_t.size * jnp.dtype(w_t.dtype).itemsize
    out_bytes = n * hidden * 4
    cost = pl.CostEstimate(
        flops=2 * n * dim_in * hidden,
        bytes_accessed=x_bytes + w_bytes + hidden * 4 + out_bytes,
        transcendentals=0,
    )

    out = pl.pallas_call(
        _make_linear_kernel(compute_dtype, precision),
        out_shape=jax.ShapeDtypeStruct((n, hidden), jnp.float32),
        grid=grid,
        in_specs=[
            # Row-tiled activations (re-fetched per hidden tile; x stream is small).
            pl.BlockSpec((tm, dim_in), lambda j, i: (i, 0)),
            # Weight tile: depends only on the outer axis -> fetched once per j.
            pl.BlockSpec((dim_in, tn), lambda j, i: (0, j)),
            # Bias tile.
            pl.BlockSpec((1, tn), lambda j, i: (0, j)),
        ],
        out_specs=pl.BlockSpec((tm, tn), lambda j, i: (i, j)),
        compiler_params=pltpu.CompilerParams(
            dimension_semantics=("parallel", "parallel"),  # megacore row/col sharding
            vmem_limit_bytes=56 * 1024 * 1024,             # <= v7x 64 MiB physical
        ),
        cost_estimate=cost,
    )(x, w_t, b2)
    # TODO(synk): if dim_in ever grows large (>~2048), add a K grid axis with an
    # f32 accumulator scratch (pl.when init/finalize) instead of one K pass.
    return out


def init_feature_encoder_params(key, dim_in, hidden):
    """Deterministic synthetic init matching nn.Linear parameter shapes."""
    k_w, k_b = jax.random.split(key)
    bound = 1.0 / jnp.sqrt(jnp.float32(dim_in))
    weight = jax.random.uniform(k_w, (hidden, dim_in), jnp.float32, -bound, bound)
    bias = jax.random.uniform(k_b, (hidden,), jnp.float32, -bound, bound)
    return weight, bias


if __name__ == "__main__":
    key = jax.random.PRNGKey(0)
    k_x, k_p = jax.random.split(key)

    N, DIM_IN, HIDDEN = 8, 4, 32  # small shapes: 8 nodes, dim_in=4, hidden=32
    x = jax.random.normal(k_x, (N, DIM_IN), jnp.float32)
    weight, bias = init_feature_encoder_params(k_p, DIM_IN, HIDDEN)

    out = feature_encoder_forward(x, weight, bias)
    jax.block_until_ready(out)

    # Reference check against plain JAX linear (same f32 math as torch).
    ref = jnp.dot(x.astype(jnp.float32), weight.T,
                  precision=lax.Precision.HIGHEST) + bias
    assert out.shape == (N, HIDDEN)
    assert jnp.allclose(out, ref, atol=1e-5, rtol=1e-5)

    print("KERNEL_OK")
</pallas_src>

<mosaic_0001>
module attributes {stable_mosaic.version = 11 : i64} {
  func.func @kernel(%arg0: i32, %arg1: i32, %arg2: memref<8x4xf32, #tpu.memory_space<vmem>>, %arg3: memref<4x32xf32, #tpu.memory_space<vmem>>, %arg4: memref<1x32xf32, #tpu.memory_space<vmem>>, %arg5: memref<8x32xf32, #tpu.memory_space<vmem>>) attributes {dimension_semantics = [#tpu.dimension_semantics<parallel>, #tpu.dimension_semantics<parallel>], iteration_bounds = array<i64: 1, 1>, scalar_prefetch = 0 : i64, scratch_operands = 0 : i64, tpu.core_type = #tpu.core_type<tc>, window_params = [{transform_indices = @transform_0, window_bounds = array<i64: 8, 4>}, {transform_indices = @transform_1, window_bounds = array<i64: 4, 32>}, {transform_indices = @transform_2, window_bounds = array<i64: 1, 32>}, {transform_indices = @transform_3, window_bounds = array<i64: 8, 32>}]} {
    %c0 = arith.constant 0 : index
    %c0_0 = arith.constant 0 : index
    %0 = vector.load %arg2[%c0, %c0_0] : memref<8x4xf32, #tpu.memory_space<vmem>>, vector<8x4xf32>
    %c0_1 = arith.constant 0 : index
    %c0_2 = arith.constant 0 : index
    %1 = vector.load %arg3[%c0_1, %c0_2] : memref<4x32xf32, #tpu.memory_space<vmem>>, vector<4x32xf32>
    %cst = arith.constant dense<0.000000e+00> : vector<8x32xf32>
    %2 = tpu.matmul %0, %1, %cst {dimension_numbers = #tpu.dot_dimension_numbers<[1], [0], [0], [1], [0, 0, 1, 1], [], []>, precision = #tpu.contract_precision<fp32>} : vector<8x4xf32>, vector<4x32xf32>, vector<8x32xf32> -> vector<8x32xf32>
    %c0_3 = arith.constant 0 : index
    %c0_4 = arith.constant 0 : index
    %3 = vector.load %arg4[%c0_3, %c0_4] : memref<1x32xf32, #tpu.memory_space<vmem>>, vector<1x32xf32>
    %4 = vector.broadcast %3 : vector<1x32xf32> to vector<8x32xf32>
    %5 = arith.addf %2, %4 : vector<8x32xf32>
    %c0_5 = arith.constant 0 : index
    %c0_6 = arith.constant 0 : index
    %6 = vector.load %arg5[%c0_5, %c0_6] : memref<8x32xf32, #tpu.memory_space<vmem>>, vector<8x32xf32>
    tpu.vector_store %arg5[%c0_5, %c0_6], %5 {strides = array<i32>} : memref<8x32xf32, #tpu.memory_space<vmem>>, vector<8x32xf32>,
    return
  }
  func.func @transform_0(%arg0: i32, %arg1: i32) -> (i32, i32) {
    %c0_i32 = arith.constant 0 : i32
    %c0_i32_0 = arith.constant 0 : i32
    return %arg1, %c0_i32 : i32, i32
  }
  func.func @transform_1(%arg0: i32, %arg1: i32) -> (i32, i32) {
    %c0_i32 = arith.constant 0 : i32
    %c0_i32_0 = arith.constant 0 : i32
    return %c0_i32, %arg0 : i32, i32
  }
  func.func @transform_2(%arg0: i32, %arg1: i32) -> (i32, i32) {
    %c0_i32 = arith.constant 0 : i32
    %c0_i32_0 = arith.constant 0 : i32
    return %c0_i32, %arg0 : i32, i32
  }
  func.func @transform_3(%arg0: i32, %arg1: i32) -> (i32, i32) {
    %c0_i32 = arith.constant 0 : i32
    return %arg1, %arg0 : i32, i32
  }
}

</mosaic_0001>

<bundles_post_ra>
// kernel: feature_encoder_forward.1
= control target key start
LH: loop header
LB: loop body
LE: loop exit
PB: predicated region body
PF: predicated region fallthrough
CT: control target
= control target key end

     0   :  { %vm25_vm0 = vcmask 1043456   ;;  %vm21_vm1 = vcmask 31744   ;;  %s254_s0 = inlined_call_operand.vmem [shape: f32[8,4], index: 0, kind: input, shape index: {}]   ;;  %s255_s1 = inlined_call_operand.vmem [shape: f32[4,32], index: 1, kind: input, shape index: {}]   ;;  %s256_s2 = inlined_call_operand.vmem [shape: f32[1,32], index: 2, kind: input, shape index: {}]   ;;  %s257_s3 = inlined_call_operand.hbm [shape: f32[8,32], index: 3, kind: output, shape index: {}]  }
   0x1   :  { %v16_v0 = vld [vmem:[%s255_s1] sm:$0xf] }
   0x2   :  { %v15_v1 = vld [vmem:[%s254_s0] sm:$0xff]  ;;  %v27_v2 = vsel %vm25_vm0, %v16_v0, 0 }
   0x3   :  { %v23_v3 = vsel %vm21_vm1, %v15_v1, 0  ;;  %v44_v4 = vand.u32 4294901760, %v27_v2 }
   0x4   :  { %v46_v5 = vand.u32 4294901760, %v23_v3 }
   0x5   :  { %8 = vsyncpa [#allocation3], 0  ;;  %v71_v6 = vsub.f32 %v27_v2, %v44_v4  ;;  %45 = vmatpush.msra.mxu0 %v44_v4  ;;  %121 = vmatpush.msra.mxu3 %v44_v4  ;;  %v194_v14 = vld [vmem:[%s256_s2] ss:$0 sm:$0xff]  ;;  %s221_s16 = smov [#allocation2]   ;;  %s184_s20 = sshll.u32 %s257_s3, 4  ;;  %s185_s20 = int_to_ptr.hbm [resolvable:$true] %s184_s20 }
   0x6   :  { %v47_v7 = vsub.f32 %v23_v3, %v46_v5  ;;  %s182_s17 = sshll.u32 %s221_s16, 4  ;;  %vm175_vm2 = vcmask 261120   ;;  %s183_s17 = int_to_ptr.vmem [resolvable:$true] %s182_s17 }
   0x7   :  { %98 = vmatpush.msra.mxu2 %v71_v6  ;;  %v72_v9 = vand.u32 4294901760, %v71_v6 }
   0x8   :  { %v48_v8 = vand.u32 4294901760, %v47_v7  ;;  %101 = vmatmul.f32.vlgmr.msra.gmra.mxu2 %v47_v7 }
   0x9   :  { %147 = vmatpush.msrb.mxu0 %v72_v9  ;;  %v73_v11 = vsub.f32 %v71_v6, %v72_v9 }
   0xa   :  { %v49_v10 = vsub.f32 %v47_v7, %v48_v8  ;;  %125 = vmatmul.f32.vlgmr.msra.gmra.mxu3 %v48_v8 }
   0xb   :  { %v74_v13 = vand.u32 4294901760, %v73_v11 }
   0xc   :  { %v50_v12 = vand.u32 4294901760, %v49_v10 }
   0xd   :  { %75 = vmatpush.msra.mxu1 %v74_v13 }
   0xe   :  { %51 = vmatmul.f32.vlgmr.msra.gmra.mxu0 %v50_v12  ;;  %77 = vmatmul.f32.vlgmr.msra.gmra.mxu1 %v46_v5 }
   0xf   :  { %169 = vmatpush.msrb.mxu1 %v44_v4 }
  0x16   :  { %149 = vmatmul.f32.vlgmr.msrb.gmra.mxu0 %v46_v5  ;;  %171 = vmatmul.f32.vlgmr.msrb.gmra.mxu1 %v46_v5 }
  0x8b   :  { %v52_v15 = vpop.f32.mrf.mxu0  ;;  %v78_v17 = vpop.f32.mrf.mxu1 }
  0x8c   :  { %v53_v16 = vadd.f32 %v194_v14, %v52_v15  ;;  %v102_v18 = vpop.f32.mrf.mxu2 }
  0x8d   :  { %v126_v20 = vpop.f32.mrf.mxu3 }
  0x8e   :  { %v79_v19 = vadd.f32 %v78_v17, %v53_v16 }
  0x90   :  { %v103_v21 = vadd.f32 %v102_v18, %v79_v19 }
  0x92   :  { %v127_v22 = vadd.f32 %v126_v20, %v103_v21 }
  0x93   :  { %v150_v23 = vpop.f32.mrf.mxu0  ;;  %v172_v25 = vpop.f32.mrf.mxu1 }
  0x94   :  { %v151_v24 = vadd.f32 %v150_v23, %v127_v22 }
  0x96   :  { %v173_v26 = vadd.f32 %v172_v25, %v151_v24 }
  0x98   :  { %176 = vst.msk [vmem:[#allocation2] sm:$0xff] %vm175_vm2, %v173_v26 }
  0x99   :  { %187 = dma.vmem_to_hbm [thread:$0]  %s183_s17, 128, %s185_s20, [#allocation3]  }
  0x9a   :  { %219 = dma.done.wait [#allocation3], 128  }
  0x9b   :  { %220 = vsyncadd [#allocation3], 4294967168 }
  0x9c   :  { %192 = vsyncpa [#allocation3], 1 }

</bundles_post_ra>
